<compile_context>
chip_gen: v7x
topology: tpu7x:2x2x1
jax: 0.10.0
libtpu: 0.0.40
codegen_flags: <defaults>
</compile_context>

<pallas_src>
import functools
import math

import jax
import jax.numpy as jnp
from jax import lax
from jax.experimental import pallas as pl
from jax.experimental.pallas import tpu as pltpu

_LANE = 128
_SUB = 8
_DEFAULT_BLOCK_ROWS = 2048          # 2048*128*4 B = 1 MiB per f32 input block
_LOG2 = math.log(2.0)


def _round_up(x, m):
    return ((x + m - 1) // m) * m


def _loss_partial_kernel(yp_ref, y_ref, out_ref, *, loss_type, block_rows,
                         total_rows, needs_mask):
    """Writes this block's (1, 128) partial loss sum to its own output slot."""
    d = yp_ref[...].astype(jnp.float32) - y_ref[...].astype(jnp.float32)

    if needs_mask:
        # The last grid block may extend past the real rows; Pallas edge
        # padding is undefined, so zero the out-of-range rows before the loss.
        i = pl.program_id(0)
        row = lax.broadcasted_iota(jnp.int32, d.shape, 0)
        d = jnp.where(i * block_rows + row < total_rows, d, jnp.float32(0.0))

    if loss_type == "mse":
        v = d * d
    elif loss_type == "mae":
        v = jnp.abs(d)
    elif loss_type == "log_cosh":
        # Stable log(cosh(d)) = |d| + log1p(exp(-2|d|)) - log(2).
        a = jnp.abs(d)
        v = a + jnp.log1p(jnp.exp(-2.0 * a)) - jnp.float32(_LOG2)
    else:
        raise NotImplementedError(
            f"Loss function [{loss_type}] is not implemented")

    # Reduce the block along sublanes only (lane-dense (1, 128) result);
    # cross-lane / cross-block combine happens in the wrapper.
    out_ref[...] = jnp.sum(v, axis=0, keepdims=True)


def pallas_loss(y_pred, y, loss_type, block_rows=_DEFAULT_BLOCK_ROWS):
    """Equivalent of Loss(loss_type)(y_pred, y). Returns a scalar f32."""
    assert y_pred.shape == y.shape, "y_pred and y must have the same shape"
    if loss_type not in ("mse", "mae", "log_cosh"):
        raise NotImplementedError(
            f"Loss function [{loss_type}] is not implemented")

    n = 1
    for s in y_pred.shape:
        n *= s

    yp = y_pred.reshape(-1)
    yt = y.reshape(-1)

    # Pad only up to the next multiple of 128 (zero diff -> zero loss).
    rem = n % _LANE
    if rem:
        pad = _LANE - rem
        yp = jnp.pad(yp, (0, pad))
        yt = jnp.pad(yt, (0, pad))

    yp = yp.reshape(-1, _LANE)
    yt = yt.reshape(-1, _LANE)
    rows = yp.shape[0]

    # Block rows must be a multiple of the sublane count (8) unless it equals
    # the full array extent; round up so small inputs still lower cleanly.
    blk = min(block_rows, _round_up(rows, _SUB))
    num_blocks = (rows + blk - 1) // blk
    needs_mask = (rows % blk) != 0

    partials = pl.pallas_call(
        functools.partial(
            _loss_partial_kernel,
            loss_type=loss_type,
            block_rows=blk,
            total_rows=rows,
            needs_mask=needs_mask,
        ),
        out_shape=jax.ShapeDtypeStruct((num_blocks, _LANE), jnp.float32),
        grid=(num_blocks,),
        in_specs=[
            pl.BlockSpec((blk, _LANE), lambda i: (i, 0)),
            pl.BlockSpec((blk, _LANE), lambda i: (i, 0)),
        ],
        out_specs=pl.BlockSpec((1, _LANE), lambda i: (i, 0)),
        compiler_params=pltpu.CompilerParams(
            dimension_semantics=("parallel",),
        ),
    )(yp, yt)

    # Tiny final reduction over the (num_blocks, 128) partials.
    return jnp.sum(partials) / jnp.float32(n)


if __name__ == "__main__":
    key = jax.random.PRNGKey(0)
    k1, k2 = jax.random.split(key)
    # Small shapes consistent with image-to-image regression: NCHW [2, 4, 16, 16].
    y_pred = jax.random.normal(k1, (2, 4, 16, 16), dtype=jnp.float32)
    y_true = jax.random.normal(k2, (2, 4, 16, 16), dtype=jnp.float32)

    ok = True
    for loss_type in ("mse", "mae", "log_cosh"):
        out = pallas_loss(y_pred, y_true, loss_type)
        out = jax.block_until_ready(out)

        d = y_pred - y_true
        if loss_type == "mse":
            ref = jnp.mean(d * d)
        elif loss_type == "mae":
            ref = jnp.mean(jnp.abs(d))
        else:
            ref = jnp.mean(jnp.log(jnp.cosh(d)))
        ref = jax.block_until_ready(ref)

        if not bool(jnp.allclose(out, ref, rtol=1e-5, atol=1e-5)):
            ok = False
            print(f"MISMATCH {loss_type}: pallas={out} ref={ref}")

    if ok:
        print("KERNEL_OK")
</pallas_src>

<mosaic_0001>
module attributes {stable_mosaic.version = 11 : i64} {
  func.func @_loss_partial_kernel(%arg0: i32, %arg1: memref<16x128xf32, #tpu.memory_space<vmem>>, %arg2: memref<16x128xf32, #tpu.memory_space<vmem>>, %arg3: memref<1x128xf32, #tpu.memory_space<vmem>>) attributes {dimension_semantics = [#tpu.dimension_semantics<parallel>], iteration_bounds = array<i64: 1>, scalar_prefetch = 0 : i64, scratch_operands = 0 : i64, tpu.core_type = #tpu.core_type<tc>, window_params = [{transform_indices = @transform_0, window_bounds = array<i64: 16, 128>}, {transform_indices = @transform_1, window_bounds = array<i64: 16, 128>}, {transform_indices = @transform_2, window_bounds = array<i64: 1, 128>}]} {
    %c0 = arith.constant 0 : index
    %c0_0 = arith.constant 0 : index
    %0 = vector.load %arg1[%c0, %c0_0] : memref<16x128xf32, #tpu.memory_space<vmem>>, vector<16x128xf32>
    %c0_1 = arith.constant 0 : index
    %c0_2 = arith.constant 0 : index
    %1 = vector.load %arg2[%c0_1, %c0_2] : memref<16x128xf32, #tpu.memory_space<vmem>>, vector<16x128xf32>
    %2 = arith.subf %0, %1 : vector<16x128xf32>
    %3 = arith.mulf %2, %2 : vector<16x128xf32>
    %cst = arith.constant dense<0.000000e+00> : vector<128xf32>
    %4 = vector.multi_reduction <add>, %3, %cst [0] : vector<16x128xf32> to vector<128xf32>
    %5 = vector.shape_cast %4 : vector<128xf32> to vector<1x128xf32>
    %c0_3 = arith.constant 0 : index
    %c0_4 = arith.constant 0 : index
    %6 = vector.load %arg3[%c0_3, %c0_4] : memref<1x128xf32, #tpu.memory_space<vmem>>, vector<1x128xf32>
    tpu.vector_store %arg3[%c0_3, %c0_4], %5 {strides = array<i32>} : memref<1x128xf32, #tpu.memory_space<vmem>>, vector<1x128xf32>,
    return
  }
  func.func @transform_0(%arg0: i32) -> (i32, i32) {
    %c0_i32 = arith.constant 0 : i32
    %c0_i32_0 = arith.constant 0 : i32
    return %arg0, %c0_i32 : i32, i32
  }
  func.func @transform_1(%arg0: i32) -> (i32, i32) {
    %c0_i32 = arith.constant 0 : i32
    %c0_i32_0 = arith.constant 0 : i32
    return %arg0, %c0_i32 : i32, i32
  }
  func.func @transform_2(%arg0: i32) -> (i32, i32) {
    %c0_i32 = arith.constant 0 : i32
    %c0_i32_0 = arith.constant 0 : i32
    return %arg0, %c0_i32 : i32, i32
  }
}

</mosaic_0001>

<bundles_post_ra>
// kernel: tpu_custom_call.1
= control target key start
LH: loop header
LB: loop body
LE: loop exit
PB: predicated region body
PF: predicated region fallthrough
CT: control target
= control target key end

     0   :  { %7 = vsyncpa [#allocation3], 0  ;;  %s205_s0 = inlined_call_operand.hbm [shape: f32[16,128], index: 0, kind: input, shape index: {}]   ;;  %s206_s1 = inlined_call_operand.hbm [shape: f32[16,128], index: 1, kind: input, shape index: {}]   ;;  %s207_s2 = inlined_call_operand.hbm [shape: f32[1,128], index: 2, kind: output, shape index: {}]  }
   0x1   :  { %8 = vsyncpa [#allocation6], 0 }
   0x2   :  { %9 = vsyncpa [#allocation4], 0  ;;  %s149_s9 = smov [#allocation2]   ;;  %s77_s13 = scalar_lea.hbm %s205_s0, 256 }
   0x3   :  { %s15_s10 = sshll.u32 %s149_s9, 4  ;;  %p78_p0 = scmp.ne.s32.totalorder %s205_s0, %s77_s13  ;;  %s16_s10 = int_to_ptr.vmem [resolvable:$true] %s15_s10 }
   0x4   :  { %p81_p1 = scmp.lt.u32.totalorder %s77_s13, %s205_s0 }
   0x6   :  { %p83_p2 = pnand %p81_p1, %p78_p0 }
   0x8   :  { %86 = shalt.err (!%p83_p2)
}
   0x9   :  { %s87_s18 = scalar_lea.vmem %s16_s10, 256  ;;  %p92_p4 = scmp.lt.s32.totalorder %s16_s10, %s16_s10 }
   0xa   :  { %p88_p3 = scmp.ne.s32.totalorder %s16_s10, %s87_s18  ;;  %p93_p5 = scmp.lt.s32.totalorder %s87_s18, %s87_s18 }
   0xc   :  { %p94_p6 = por %p93_p5, %p92_p4 }
   0xe   :  { %p95_p7 = pnand %p94_p6, %p88_p3 }
  0x10   :  { %98 = shalt.err (!%p95_p7)
}
  0x11   :  { %s150_s19 = smov 128   ;;  %s151_s20 = smov 8  }
  0x12   :  { %21 = dma.hbm_to_vmem [thread:$0]  %s205_s0, 256, %s16_s10, [#allocation3], %s150_s19, %s150_s19, %s151_s20  }
  0x13   :  { %s152_s23 = smov [#allocation5]   ;;  %s99_s27 = scalar_lea.hbm %s206_s1, 256 }
  0x14   :  { %s27_s24 = sshll.u32 %s152_s23, 4  ;;  %p100_p8 = scmp.ne.s32.totalorder %s206_s1, %s99_s27  ;;  %s28_s24 = int_to_ptr.vmem [resolvable:$true] %s27_s24 }
  0x15   :  { %p103_p9 = scmp.lt.u32.totalorder %s99_s27, %s206_s1 }
  0x17   :  { %p105_p10 = pnand %p103_p9, %p100_p8 }
  0x19   :  { %108 = shalt.err (!%p105_p10)
}
  0x1a   :  { %s109_s4 = scalar_lea.vmem %s28_s24, 256  ;;  %p114_p12 = scmp.lt.s32.totalorder %s28_s24, %s28_s24 }
  0x1b   :  { %p110_p11 = scmp.ne.s32.totalorder %s28_s24, %s109_s4  ;;  %p115_p13 = scmp.lt.s32.totalorder %s109_s4, %s109_s4 }
  0x1d   :  { %p116_p0 = por %p115_p13, %p114_p12 }
  0x1f   :  { %p117_p1 = pnand %p116_p0, %p110_p11 }
  0x21   :  { %120 = shalt.err (!%p117_p1)
}
  0x22   :  { %33 = dma.hbm_to_vmem [thread:$0]  %s206_s1, 256, %s28_s24, [#allocation6], %s150_s19, %s150_s19, %s151_s20  }
  0x23   :  { %143 = dma.done.wait [#allocation3], 256  }
  0x24   :  { %144 = vsyncadd [#allocation3], 4294967040 }
  0x25   :  { %145 = dma.done.wait [#allocation6], 256  }
  0x26   :  { %146 = vsyncadd [#allocation6], 4294967040  ;;  %v40_v0 = vld [vmem:[#allocation2] sm:$0xff]  ;;  %v41_v1 = vld [vmem:[#allocation2 + $0x8] sm:$0xff]  ;;  %s153_s6 = smov [#allocation7]  }
  0x27   :  { %v42_v2 = vld [vmem:[#allocation5] sm:$0xff]  ;;  %v43_v3 = vld [vmem:[#allocation5 + $0x8] sm:$0xff]  ;;  %s62_s7 = sshll.u32 %s153_s6, 4  ;;  %s63_s7 = int_to_ptr.vmem [resolvable:$true] %s62_s7 }
  0x28   :  { %v44_v4 = vsub.f32 %v40_v0, %v42_v2  ;;  %v45_v5 = vsub.f32 %v41_v1, %v43_v3  ;;  %s121_s1 = scalar_lea.vmem %s63_s7, 16  ;;  %s125_s8 = scalar_lea.vmem %s63_s7, 32 }
  0x29   :  { %p122_p2 = scmp.ne.s32.totalorder %s63_s7, %s121_s1  ;;  %p126_p3 = scmp.lt.s32.totalorder %s63_s7, %s63_s7 }
  0x2a   :  { %v46_v6 = vmul.f32 %v44_v4, %v44_v4  ;;  %v47_v7 = vmul.f32 %v45_v5, %v45_v5  ;;  %p127_p4 = scmp.lt.s32.totalorder %s125_s8, %s121_s1 }
  0x2c   :  { %v48_v8 = vadd.f32 %v47_v7, %v46_v6  ;;  %p128_p5 = por %p127_p4, %p126_p3 }
  0x2e   :  { %v49_v9 = vrot.slane %v48_v8, 4  ;;  %p129_p6 = pnand %p128_p5, %p122_p2 }
  0x30   :  { %v50_v10 = vadd.f32 %v49_v9, %v48_v8 }
  0x32   :  { %v51_v11 = vrot.slane %v50_v10, 2 }
  0x34   :  { %v52_v12 = vadd.f32 %v51_v11, %v50_v10 }
  0x36   :  { %v53_v13 = vrot.slane %v52_v12, 1 }
  0x38   :  { %v54_v14 = vadd.f32 %v53_v13, %v52_v12 }
  0x3a   :  { %55 = vst [vmem:[#allocation7] sm:$0x1] %v54_v14 }
  0x3b   :  { %132 = shalt.err (!%p129_p6)
}
  0x3c   :  { %s133_s11 = scalar_lea.hbm %s207_s2, 16 }
  0x3d   :  { %p134_p7 = scmp.ne.s32.totalorder %s207_s2, %s133_s11  ;;  %p137_p8 = scmp.lt.u32.totalorder %s133_s11, %s207_s2 }
  0x3f   :  { %p139_p9 = pnand %p137_p8, %p134_p7 }
  0x41   :  { %142 = shalt.err (!%p139_p9)
}
  0x42   :  { %65 = dma.vmem_to_hbm [thread:$0]  %s63_s7, 16, %s207_s2, [#allocation4]  }
  0x43   :  { %147 = dma.done.wait [#allocation4], 16  }
  0x44   :  { %148 = vsyncadd [#allocation4], 4294967280 }
  0x45   :  { %69 = vsyncpa [#allocation3], 1 }
  0x46   :  { %70 = vsyncpa [#allocation6], 1 }
  0x47   :  { %71 = vsyncpa [#allocation4], 1 }

</bundles_post_ra>
